<compile_context>
chip_gen: v7x
topology: tpu7x:2x2x1
jax: 0.10.0
libtpu: 0.0.40
codegen_flags: <defaults>
</compile_context>

<pallas_src>
import functools
import numpy as np
import jax
import jax.numpy as jnp
from jax.experimental import pallas as pl
from jax.experimental.pallas import tpu as pltpu


def _round_up(x, m):
    return ((x + m - 1) // m) * m


# ---------------------------------------------------------------------------
# Constant precompute (exact port of the torch module's __init__ numpy code)
# ---------------------------------------------------------------------------
def _equirect_facetype(equ_h, equ_w):
    tp = np.roll(
        np.arange(4).repeat(equ_w // 4)[None, :].repeat(equ_h, 0),
        3 * equ_w // 8, 1)
    mask = np.zeros((equ_h, equ_w // 4), bool)
    idx = np.linspace(-np.pi, np.pi, equ_w // 4) / 4
    idx = equ_h // 2 - np.round(np.arctan(np.cos(idx)) * equ_h / np.pi).astype(int)
    for i, j in enumerate(idx):
        mask[:j, i] = 1
    mask = np.roll(np.concatenate([mask] * 4, 1), 3 * equ_w // 8, 1)
    tp[mask] = 4
    tp[np.flip(mask, 0)] = 5
    return tp


def _equirect_faceuv(tp, equ_h, equ_w):
    lon = ((np.linspace(0, equ_w - 1, num=equ_w, dtype=np.float32) + 0.5)
           / equ_w - 0.5) * 2 * np.pi
    lat = -((np.linspace(0, equ_h - 1, num=equ_h, dtype=np.float32) + 0.5)
            / equ_h - 0.5) * np.pi
    lon, lat = np.meshgrid(lon, lat)
    coor_u = np.zeros((equ_h, equ_w), dtype=np.float32)
    coor_v = np.zeros((equ_h, equ_w), dtype=np.float32)
    for i in range(4):
        m = tp == i
        coor_u[m] = 0.5 * np.tan(lon[m] - np.pi * i / 2)
        coor_v[m] = -0.5 * np.tan(lat[m]) / np.cos(lon[m] - np.pi * i / 2)
    m = tp == 4
    c = 0.5 * np.tan(np.pi / 2 - lat[m])
    coor_u[m] = c * np.sin(lon[m])
    coor_v[m] = c * np.cos(lon[m])
    m = tp == 5
    c = 0.5 * np.tan(np.pi / 2 - np.abs(lat[m]))
    coor_u[m] = c * np.sin(lon[m])
    coor_v[m] = -c * np.cos(lon[m])
    coor_u = np.clip(coor_u, -0.5, 0.5) * 2
    coor_v = np.clip(coor_v, -0.5, 0.5) * 2
    tp_f = tp.astype(np.float32) / 2.5 - 1
    return coor_u.astype(np.float32), coor_v.astype(np.float32), tp_f


def build_sample_matrix(face_w, equ_h, equ_w):
    """Dense (P, S) trilinear interpolation matrix reproducing F.grid_sample
    ('bilinear' on 5-D == trilinear, align_corners=True, padding_mode='border').

    The S axis is flattened face-major: flat = face*fw*fw + y*fw + x (the same
    (6, fw, fw) layout the torch module feeds grid_sample after its split/cat);
    keeping each face contiguous is what makes the block sparsity real.

    Returns (Wmat, tp_flat) where tp_flat is the per-output-pixel face id used
    for the output-column permutation."""
    tp = _equirect_facetype(equ_h, equ_w)
    coor_u, coor_v, tp_f = _equirect_faceuv(tp, equ_h, equ_w)
    D, H, W = 6, face_w, face_w

    def unnorm(coord, size):                        # align_corners=True
        return (coord.astype(np.float32) + 1.0) * 0.5 * np.float32(size - 1)

    ix = np.clip(unnorm(coor_u, W), 0, W - 1).astype(np.float32)   # border pad
    iy = np.clip(unnorm(coor_v, H), 0, H - 1).astype(np.float32)
    iz = np.clip(unnorm(tp_f, D), 0, D - 1).astype(np.float32)

    x0 = np.floor(ix); x1 = x0 + 1
    y0 = np.floor(iy); y1 = y0 + 1
    z0 = np.floor(iz); z1 = z0 + 1
    wx1 = ix - x0; wx0 = 1.0 - wx1
    wy1 = iy - y0; wy0 = 1.0 - wy1
    wz1 = iz - z0; wz0 = 1.0 - wz1

    P = equ_h * equ_w
    S = D * H * W
    Wmat = np.zeros((P, S), dtype=np.float32)
    p_idx = np.arange(P)
    corners = [
        (z0, y0, x0, wz0 * wy0 * wx0), (z0, y0, x1, wz0 * wy0 * wx1),
        (z0, y1, x0, wz0 * wy1 * wx0), (z0, y1, x1, wz0 * wy1 * wx1),
        (z1, y0, x0, wz1 * wy0 * wx0), (z1, y0, x1, wz1 * wy0 * wx1),
        (z1, y1, x0, wz1 * wy1 * wx0), (z1, y1, x1, wz1 * wy1 * wx1),
    ]
    for zc, yc, xc, wc in corners:
        zi = np.clip(zc, 0, D - 1).astype(np.int64).reshape(-1)
        yi = np.clip(yc, 0, H - 1).astype(np.int64).reshape(-1)
        xi = np.clip(xc, 0, W - 1).astype(np.int64).reshape(-1)
        flat = zi * (H * W) + yi * W + xi           # face-major (face, y, x)
        # PyTorch skips out-of-range corners, but their weight is 0, so
        # clamped-index accumulation is equivalent.
        np.add.at(Wmat, (p_idx, flat), wc.reshape(-1).astype(np.float32))
    return Wmat, tp.reshape(-1)


# ---------------------------------------------------------------------------
# Kernel: CSR-style block-sparse matmul, f32 accumulation into the resident
# output block.
# ---------------------------------------------------------------------------
def _c2e_kernel(flag_ref, ntile_ref, blk_ref, kblk_ref, a_ref, b_ref, o_ref,
                *, steps_per_chunk, a_resident):
    del ntile_ref, blk_ref                     # only consumed by the index_maps
    idx = pl.program_id(0) * steps_per_chunk + pl.program_id(1)
    flag = flag_ref[idx]                       # 1: first block of an N tile
                                               # 0: further block of the tile
                                               # 2: chunk-balancing pad (no-op)

    @pl.when(flag == 1)
    def _init():
        # The output block stays VMEM-resident for all consecutive steps of
        # its N tile, so accumulate straight into it (f32); no scratch needed.
        o_ref[...] = jnp.zeros_like(o_ref)

    @pl.when(flag < 2)
    def _accumulate():
        if a_resident:
            a = a_ref[kblk_ref[idx]]           # (M, tk) slice of resident A
        else:
            a = a_ref[0]                       # (M, tk) streamed A tile
        # Weights are stored narrow (bf16 / int8) to halve/quarter the
        # dominant HBM stream; activations stay f32 for parity with the torch
        # reference.  The upcast is a VPU op hidden behind the B DMA.
        b = b_ref[0].astype(jnp.float32)       # (tk, tn)
        o_ref[...] += jnp.dot(a, b, preferred_element_type=jnp.float32)


# Nominal per-grid-step fixed overhead expressed in "HBM bytes" (~0.35 us at
# ~1.3 TB/s); used only by the host-side tile sweep to trade step count
# against wasted zero-region streaming.
_STEP_OVERHEAD_BYTES = 450_000


class Cube2EquirecPallas:
    """JAX/Pallas port of the PyTorch Cube2Equirec module (forward only).

    Input : (bs, ch, face_w, 6*face_w)   -- six cube faces along W (0F1R2B3L4U5D)
    Output: (bs, ch, equ_h, equ_w)
    """

    def __init__(self, face_w, equ_h, equ_w, *,
                 weight_dtype=jnp.bfloat16,
                 tile_candidates=None,
                 b_vmem_budget_bytes=28 * 1024 * 1024,
                 n_parallel_chunks=2,
                 b_buffer_count=2,
                 a_resident_max_bytes=4 * 1024 * 1024):
        self.face_w, self.equ_h, self.equ_w = face_w, equ_h, equ_w
        self.weight_dtype = np.dtype(weight_dtype)
        self.b_buffer_count = int(b_buffer_count)
        self.a_resident_max_bytes = int(a_resident_max_bytes)

        K = 6 * face_w * face_w                 # cube features (contraction)
        N = equ_h * equ_w                       # equirect pixels
        self.K, self.N = K, N

        # TODO(synk): for production-scale shapes (e.g. face_w=256, 512x1024
        # equirect) the dense host-side (P, S) matrix cannot be materialised;
        # replace this formulation with a (P, 4) index/weight table feeding a
        # gather-style kernel (10-100x less HBM traffic than any matmul).
        Wmat, tp_flat = build_sample_matrix(face_w, equ_h, equ_w)   # (N, K)

        # Output-column permutation: group equirect pixels by cube face so a
        # tn tile touches as few K blocks as possible (K is face-major).
        perm = np.argsort(tp_flat, kind="stable")
        inv_perm = np.empty(N, dtype=np.int64)
        inv_perm[perm] = np.arange(N)
        self.inv_perm = jnp.asarray(inv_perm.astype(np.int32))
        Wt = np.ascontiguousarray(Wmat.T[:, perm])                  # (K, N)

        # ---- tile sweep driven by streamed bytes + per-step overhead -------
        w_itemsize = self.weight_dtype.itemsize
        if tile_candidates is None:
            tile_candidates = [(tk0, tn0)
                               for tk0 in (256, 512, 1024, 2048)
                               for tn0 in (512, 1024, 2048, 4096)]
        cands = []
        for tk0, tn0 in tile_candidates:
            tk = min(_round_up(tk0, 128), _round_up(K, 128))
            tn = min(_round_up(tn0, 128), _round_up(N, 128))
            if (tk, tn) not in cands:
                cands.append((tk, tn))

        def b_vmem(tk, tn):
            # buffered weight tiles + f32 upcast temporary inside the kernel
            cast_tmp = tk * tn * 4 if self.weight_dtype != np.dtype(np.float32) else 0
            return self.b_buffer_count * tk * tn * w_itemsize + cast_tmp

        fitting = [c for c in cands if b_vmem(*c) <= b_vmem_budget_bytes]
        if not fitting:
            fitting = [min(cands, key=lambda c: b_vmem(*c))]
        # v7x megacore: prefer configs where the parallel axis has >= 2 tiles.
        multi = [c for c in fitting if _round_up(N, c[1]) // c[1] >= 2]
        if multi:
            fitting = multi

        def blocks_nz(tk, tn):
            Kp, Np = _round_up(K, tk), _round_up(N, tn)
            pad = np.zeros((Kp, Np), dtype=bool)
            pad[:K, :N] = Wt != 0
            return pad.reshape(Kp // tk, tk, Np // tn, tn).any(axis=(1, 3))

        def cost(tk, tn):
            nb = int(blocks_nz(tk, tn).sum())
            return nb * tk * tn * w_itemsize + nb * _STEP_OVERHEAD_BYTES

        self.tk, self.tn = min(fitting, key=lambda c: cost(*c))
        tk, tn = self.tk, self.tn
        self.Kp, self.Np = _round_up(K, tk), _round_up(N, tn)
        self.nkb, self.nnb = self.Kp // tk, self.Np // tn

        # ---- pack the non-zero weight blocks + build CSR-style step tables -
        Wt_pad = np.zeros((self.Kp, self.Np), dtype=np.float32)
        Wt_pad[:K, :N] = Wt
        nz = blocks_nz(tk, tn)                                  # (nkb, nnb)
        tile_kblocks = [np.nonzero(nz[:, j])[0] for j in range(self.nnb)]
        counts = np.array([len(t) for t in tile_kblocks], dtype=np.int64)
        # Every tile covers at least one real pixel, whose weights sum to 1.
        assert counts.min() >= 1

        n_chunks = max(1, min(int(n_parallel_chunks), self.nnb))
        self.n_chunks = n_chunks
        chunk_tiles = [[] for _ in range(n_chunks)]
        chunk_tot = np.zeros(n_chunks, dtype=np.int64)
        for j in np.argsort(-counts, kind="stable"):            # balance bytes
            c = int(np.argmin(chunk_tot))
            chunk_tiles[c].append(int(j))
            chunk_tot[c] += counts[j]
        for tiles in chunk_tiles:
            tiles.sort()                                        # forward DMA order
            assert tiles
        self.steps_per_chunk = int(chunk_tot.max())
        spc = self.steps_per_chunk

        flag = np.full((n_chunks, spc), 2, dtype=np.int32)      # 2 = pad step
        ntile = np.zeros((n_chunks, spc), dtype=np.int32)
        blk = np.zeros((n_chunks, spc), dtype=np.int32)
        kblk = np.zeros((n_chunks, spc), dtype=np.int32)
        packed = []
        for c, tiles in enumerate(chunk_tiles):
            s = 0
            for j in tiles:
                for t, kb in enumerate(tile_kblocks[j]):
                    packed.append(Wt_pad[kb * tk:(kb + 1) * tk,
                                         j * tn:(j + 1) * tn])
                    flag[c, s] = 1 if t == 0 else 0
                    ntile[c, s] = j
                    blk[c, s] = len(packed) - 1
                    kblk[c, s] = kb
                    s += 1
            # Padding steps repeat the last real step's indices: Pallas sees an
            # unchanged block index (no DMA) and flag==2 skips the math.
            ntile[c, s:] = ntile[c, s - 1]
            blk[c, s:] = blk[c, s - 1]
            kblk[c, s:] = kblk[c, s - 1]

        packed = np.stack(packed, axis=0)                       # (nnz, tk, tn)
        if self.weight_dtype == np.dtype(np.int8):
            # v5e/v6e-friendly int8 weights; one global dequant scale folded
            # into the tiny f32 output in __call__.
            packed = np.clip(np.rint(packed * 127.0), -127, 127).astype(np.int8)
            self.out_scale = 1.0 / 127.0
            self.W_packed = jnp.asarray(packed)
        else:
            # TODO(synk): fp8 (e4m3) weight path for v7x's fp8 MXU.
            self.out_scale = 1.0
            self.W_packed = jnp.asarray(packed, dtype=self.weight_dtype)

        self.step_flag = jnp.asarray(flag.reshape(-1))
        self.step_ntile = jnp.asarray(ntile.reshape(-1))
        self.step_blk = jnp.asarray(blk.reshape(-1))
        self.step_kblk = jnp.asarray(kblk.reshape(-1))
        self._call_cache = {}

    # ------------------------------------------------------------------ #
    def _vmem_limit_bytes(self, M, a_resident):
        w_itemsize = self.weight_dtype.itemsize
        b_alloc = self.b_buffer_count * self.tk * self.tn * w_itemsize
        cast_tmp = (self.tk * self.tn * 4
                    if self.weight_dtype != np.dtype(np.float32) else 0)
        a_alloc = (2 * self.nkb * M * self.tk * 4 if a_resident
                   else 2 * M * self.tk * 4)
        o_alloc = 2 * M * self.tn * 4
        need = b_alloc + cast_tmp + a_alloc + o_alloc
        # Generous slack for compiler-internal scratch, but never below the
        # default scoped limit; the tile budget keeps this well under a v7x
        # TensorCore's 64 MiB physical VMEM (instead of requesting all of it).
        return int(max(need + max(need // 2, 8 * 1024 * 1024),
                       32 * 1024 * 1024))

    def _build_call(self, M, a_resident):
        key = (M, a_resident)
        if key in self._call_cache:
            return self._call_cache[key]
        tk, tn, spc = self.tk, self.tn, self.steps_per_chunk

        def a_map(c, s, flag, ntile, blk, kblk):
            if a_resident:
                return (0, 0, 0)                    # whole A resident in VMEM
            return (kblk[c * spc + s], 0, 0)

        def b_map(c, s, flag, ntile, blk, kblk):
            return (blk[c * spc + s], 0, 0)         # packed non-zero block id

        def o_map(c, s, flag, ntile, blk, kblk):
            return (0, ntile[c * spc + s])

        a_block = (self.nkb, M, tk) if a_resident else (1, M, tk)
        b_kwargs = {}
        if self.b_buffer_count != 2:
            # Deeper prefetch across non-adjacent packed blocks if a profile
            # ever shows exposed DMA; default stays at double buffering.
            b_kwargs = dict(pipeline_mode=pl.Buffered(self.b_buffer_count))

        kernel = functools.partial(_c2e_kernel, steps_per_chunk=spc,
                                   a_resident=a_resident)
        call = pl.pallas_call(
            kernel,
            out_shape=jax.ShapeDtypeStruct((M, self.Np), jnp.float32),
            grid_spec=pltpu.PrefetchScalarGridSpec(
                num_scalar_prefetch=4,              # flag/ntile/blk/kblk -> SMEM
                grid=(self.n_chunks, spc),
                in_specs=[
                    pl.BlockSpec(a_block, a_map),
                    pl.BlockSpec((1, tk, tn), b_map, **b_kwargs),
                ],
                out_specs=pl.BlockSpec((M, tn), o_map),
            ),
            compiler_params=pltpu.CompilerParams(
                dimension_semantics=("parallel", "arbitrary"),
                vmem_limit_bytes=self._vmem_limit_bytes(M, a_resident),
            ),
        )
        self._call_cache[key] = call
        return call

    def __call__(self, cube_feat):
        bs, ch, h, w = cube_feat.shape
        assert h == self.face_w and w == 6 * self.face_w
        fw, M = self.face_w, bs * ch
        # Same face split/stack the torch module performs before grid_sample:
        # (bs, ch, y, face*fw + x) -> (bs*ch, face*fw*fw + y*fw + x).
        a = cube_feat.reshape(bs, ch, fw, 6, fw).transpose(0, 1, 3, 2, 4)
        a = a.reshape(M, self.K).astype(jnp.float32)    # activations stay f32
        if self.Kp != self.K:
            a = jnp.pad(a, ((0, 0), (0, self.Kp - self.K)))
        a = a.reshape(M, self.nkb, self.tk).transpose(1, 0, 2)   # (nkb, M, tk)

        a_resident = self.nkb * M * self.tk * 4 <= self.a_resident_max_bytes
        out = self._build_call(M, a_resident)(
            self.step_flag, self.step_ntile, self.step_blk, self.step_kblk,
            a, self.W_packed)                       # (M, Np) f32, permuted cols
        out = jnp.take(out, self.inv_perm, axis=1)  # undo pixel permutation
        if self.out_scale != 1.0:
            out = out * jnp.float32(self.out_scale)
        return out.reshape(bs, ch, self.equ_h, self.equ_w)


if __name__ == "__main__":
    bs, ch = 2, 4
    face_w, equ_h, equ_w = 8, 16, 32            # K = 384, N = 512
    K = 6 * face_w * face_w

    key = jax.random.PRNGKey(0)
    x = jax.random.normal(key, (bs, ch, face_w, 6 * face_w), dtype=jnp.float32)

    # Exact-semantics dense reference of the same contraction (f32 weights).
    Wmat, _ = build_sample_matrix(face_w, equ_h, equ_w)           # (N, K)

    def to_rows(arr4):
        return (np.asarray(arr4).reshape(bs, ch, face_w, 6, face_w)
                .transpose(0, 1, 3, 2, 4).reshape(bs * ch, K).astype(np.float32))

    a_np = to_rows(x)
    ref_f32 = (a_np @ Wmat.T).reshape(bs, ch, equ_h, equ_w)

    # References matching the kernel's weight quantisation choices.
    W_bf16 = np.asarray(jnp.asarray(Wmat, dtype=jnp.bfloat16).astype(jnp.float32))
    ref_bf16 = (a_np @ W_bf16.T).reshape(bs, ch, equ_h, equ_w)
    W_i8 = np.clip(np.rint(Wmat * 127.0), -127, 127).astype(np.float32)
    ref_i8 = ((a_np @ W_i8.T) / np.float32(127.0)).reshape(bs, ch, equ_h, equ_w)

    # NOTE on tolerances: the MXU may evaluate f32 matmuls with bf16 operand
    # passes at default precision, so checks against f32 references are loose;
    # the tight machinery check (2) feeds bf16-representable activations so it
    # is exact under any MXU precision mode.

    # 1) default: swept (~large) tiles, bf16 weights, resident f32 activations.
    m1 = Cube2EquirecPallas(face_w, equ_h, equ_w)
    o1 = jax.block_until_ready(m1(x))
    assert o1.shape == (bs, ch, equ_h, equ_w), o1.shape
    np.testing.assert_allclose(np.asarray(o1), ref_bf16, rtol=2e-2, atol=2e-2)
    np.testing.assert_allclose(np.asarray(o1), ref_f32, rtol=5e-2, atol=5e-2)

    # 2) small tiles: exercises the multi-chunk CSR grid, multiple K blocks per
    #    output tile and chunk-balancing padding steps.  Tight machinery check.
    x_q = x.astype(jnp.bfloat16).astype(jnp.float32)
    ref_q = (to_rows(x_q) @ W_bf16.T).reshape(bs, ch, equ_h, equ_w)
    m2 = Cube2EquirecPallas(face_w, equ_h, equ_w, tile_candidates=[(128, 128)])
    o2 = jax.block_until_ready(m2(x_q))
    np.testing.assert_allclose(np.asarray(o2), ref_q, rtol=1e-4, atol=1e-4)

    # 3) f32 weights + streamed (non-resident) A path.
    m3 = Cube2EquirecPallas(face_w, equ_h, equ_w, weight_dtype=jnp.float32,
                            tile_candidates=[(128, 256)],
                            a_resident_max_bytes=0)
    o3 = jax.block_until_ready(m3(x))
    np.testing.assert_allclose(np.asarray(o3), ref_f32, rtol=5e-2, atol=5e-2)

    # 4) int8 weights (v5e/v6e-oriented option), global dequant on the output.
    m4 = Cube2EquirecPallas(face_w, equ_h, equ_w, weight_dtype=jnp.int8)
    o4 = jax.block_until_ready(m4(x))
    np.testing.assert_allclose(np.asarray(o4), ref_i8, rtol=2e-2, atol=2e-2)
    np.testing.assert_allclose(np.asarray(o4), ref_f32, rtol=1.5e-1, atol=1.5e-1)

    print("KERNEL_OK")
</pallas_src>

<mosaic_0001>
module attributes {stable_mosaic.version = 11 : i64} {
  func.func @_c2e_kernel(%arg0: i32, %arg1: i32, %arg2: memref<1xi32, #tpu.memory_space<smem>>, %arg3: memref<1xi32, #tpu.memory_space<smem>>, %arg4: memref<1xi32, #tpu.memory_space<smem>>, %arg5: memref<1xi32, #tpu.memory_space<smem>>, %arg6: memref<1x8x384xf32, #tpu.memory_space<vmem>>, %arg7: memref<1x384x512xbf16, #tpu.memory_space<vmem>>, %arg8: memref<8x512xf32, #tpu.memory_space<vmem>>) attributes {dimension_semantics = [#tpu.dimension_semantics<parallel>, #tpu.dimension_semantics<arbitrary>], iteration_bounds = array<i64: 1, 1>, scalar_prefetch = 4 : i64, scratch_operands = 0 : i64, tpu.core_type = #tpu.core_type<tc>, window_params = [{pipeline_mode = #tpu.pipeline_mode<synchronous>, transform_indices = @transform_0, window_bounds = array<i64: 1, 8, 384>}, {transform_indices = @transform_1, window_bounds = array<i64: 1, 384, 512>}, {transform_indices = @transform_2, window_bounds = array<i64: 8, 512>}]} {
    %c1_i32 = arith.constant 1 : i32
    %0 = arith.muli %arg0, %c1_i32 : i32
    %1 = arith.addi %0, %arg1 : i32
    %2 = arith.index_cast %1 : i32 to index
    %3 = memref.load %arg2[%2] : memref<1xi32, #tpu.memory_space<smem>>
    %c1_i32_0 = arith.constant 1 : i32
    %4 = arith.cmpi eq, %3, %c1_i32_0 : i32
    %5 = arith.extui %4 : i1 to i32
    %c0_i32 = arith.constant 0 : i32
    %6 = arith.cmpi ne, %5, %c0_i32 : i32
    scf.if %6 {
      %cst = arith.constant 0.000000e+00 : f32
      %10 = vector.broadcast %cst : f32 to vector<8x512xf32>
      %c0 = arith.constant 0 : index
      %c0_2 = arith.constant 0 : index
      %11 = vector.load %arg8[%c0, %c0_2] : memref<8x512xf32, #tpu.memory_space<vmem>>, vector<8x512xf32>
      tpu.vector_store %arg8[%c0, %c0_2], %10 {strides = array<i32>} : memref<8x512xf32, #tpu.memory_space<vmem>>, vector<8x512xf32>,
    } else {
    }
    %c2_i32 = arith.constant 2 : i32
    %7 = arith.cmpi slt, %3, %c2_i32 : i32
    %8 = arith.extui %7 : i1 to i32
    %c0_i32_1 = arith.constant 0 : i32
    %9 = arith.cmpi ne, %8, %c0_i32_1 : i32
    scf.if %9 {
      %10 = arith.index_cast %1 : i32 to index
      %11 = memref.load %arg5[%10] : memref<1xi32, #tpu.memory_space<smem>>
      %12 = arith.index_cast %11 : i32 to index
      %c0 = arith.constant 0 : index
      %c0_2 = arith.constant 0 : index
      %13 = vector.load %arg6[%12, %c0, %c0_2] : memref<1x8x384xf32, #tpu.memory_space<vmem>>, vector<1x8x384xf32>
      %14 = vector.shape_cast %13 : vector<1x8x384xf32> to vector<8x384xf32>
      %c0_3 = arith.constant 0 : index
      %c0_4 = arith.constant 0 : index
      %c0_5 = arith.constant 0 : index
      %15 = vector.load %arg7[%c0_3, %c0_4, %c0_5] : memref<1x384x512xbf16, #tpu.memory_space<vmem>>, vector<1x384x512xbf16>
      %16 = vector.shape_cast %15 : vector<1x384x512xbf16> to vector<384x512xbf16>
      %17 = arith.extf %16 : vector<384x512xbf16> to vector<384x512xf32>
      %c0_6 = arith.constant 0 : index
      %c0_7 = arith.constant 0 : index
      %18 = vector.load %arg8[%c0_6, %c0_7] : memref<8x512xf32, #tpu.memory_space<vmem>>, vector<8x512xf32>
      %cst = arith.constant dense<0.000000e+00> : vector<8x512xf32>
      %19 = tpu.matmul %14, %17, %cst {dimension_numbers = #tpu.dot_dimension_numbers<[1], [0], [0], [1], [0, 0, 1, 1], [], []>} : vector<8x384xf32>, vector<384x512xf32>, vector<8x512xf32> -> vector<8x512xf32>
      %20 = arith.addf %18, %19 : vector<8x512xf32>
      %c0_8 = arith.constant 0 : index
      %c0_9 = arith.constant 0 : index
      %21 = vector.load %arg8[%c0_8, %c0_9] : memref<8x512xf32, #tpu.memory_space<vmem>>, vector<8x512xf32>
      tpu.vector_store %arg8[%c0_8, %c0_9], %20 {strides = array<i32>} : memref<8x512xf32, #tpu.memory_space<vmem>>, vector<8x512xf32>,
    } else {
    }
    return
  }
  func.func @transform_0(%arg0: i32, %arg1: i32, %arg2: memref<1xi32, #tpu.memory_space<smem>>, %arg3: memref<1xi32, #tpu.memory_space<smem>>, %arg4: memref<1xi32, #tpu.memory_space<smem>>, %arg5: memref<1xi32, #tpu.memory_space<smem>>) -> (i32, i32, i32) {
    %c0_i32 = arith.constant 0 : i32
    %c0_i32_0 = arith.constant 0 : i32
    %c0_i32_1 = arith.constant 0 : i32
    %c0_i32_2 = arith.constant 0 : i32
    return %c0_i32, %c0_i32_0, %c0_i32_1 : i32, i32, i32
  }
  func.func @transform_1(%arg0: i32, %arg1: i32, %arg2: memref<1xi32, #tpu.memory_space<smem>>, %arg3: memref<1xi32, #tpu.memory_space<smem>>, %arg4: memref<1xi32, #tpu.memory_space<smem>>, %arg5: memref<1xi32, #tpu.memory_space<smem>>) -> (i32, i32, i32) {
    %c1_i32 = arith.constant 1 : i32
    %0 = arith.muli %arg0, %c1_i32 : i32
    %1 = arith.addi %0, %arg1 : i32
    %2 = arith.index_cast %1 : i32 to index
    %3 = memref.load %arg4[%2] : memref<1xi32, #tpu.memory_space<smem>>
    %c0_i32 = arith.constant 0 : i32
    %c0_i32_0 = arith.constant 0 : i32
    %c0_i32_1 = arith.constant 0 : i32
    return %3, %c0_i32, %c0_i32_0 : i32, i32, i32
  }
  func.func @transform_2(%arg0: i32, %arg1: i32, %arg2: memref<1xi32, #tpu.memory_space<smem>>, %arg3: memref<1xi32, #tpu.memory_space<smem>>, %arg4: memref<1xi32, #tpu.memory_space<smem>>, %arg5: memref<1xi32, #tpu.memory_space<smem>>) -> (i32, i32) {
    %c1_i32 = arith.constant 1 : i32
    %0 = arith.muli %arg0, %c1_i32 : i32
    %1 = arith.addi %0, %arg1 : i32
    %2 = arith.index_cast %1 : i32 to index
    %3 = memref.load %arg3[%2] : memref<1xi32, #tpu.memory_space<smem>>
    %c0_i32 = arith.constant 0 : i32
    %c0_i32_0 = arith.constant 0 : i32
    return %c0_i32, %3 : i32, i32
  }
}

</mosaic_0001>

<bundles_post_ra>
// kernel: tpu_custom_call.1
= control target key start
LH: loop header
LB: loop body
LE: loop exit
PB: predicated region body
PF: predicated region fallthrough
CT: control target
= control target key end

     0   :  { %s1318_s0 = inlined_call_operand.<no memory space> [shape: s32[1], index: 0, kind: input, shape index: {}]   ;;  %s1319_s1 = inlined_call_operand.<no memory space> [shape: s32[1], index: 1, kind: input, shape index: {}]   ;;  %s1320_s2 = inlined_call_operand.<no memory space> [shape: s32[1], index: 2, kind: input, shape index: {}]   ;;  %s1321_s3 = inlined_call_operand.<no memory space> [shape: s32[1], index: 3, kind: input, shape index: {}]   ;;  %s1322_s4 = inlined_call_operand.hbm [shape: f32[1,8,384], index: 4, kind: input, shape index: {}]   ;;  %s1323_s5 = inlined_call_operand.hbm [shape: bf16[1,384,512], index: 5, kind: input, shape index: {}]   ;;  %s1324_s6 = inlined_call_operand.hbm [shape: f32[8,512], index: 6, kind: output, shape index: {}]  }
   0x1   :  { %12 = sst [smem:[#allocation4]] %s1319_s1 }
   0x2   :  { %14 = sst [smem:[#allocation6]] %s1321_s3 }
   0x3   :  { %15 = vsyncpa [#allocation8], 0 }
   0x4   :  { %16 = vsyncpa [#allocation11], 0 }
   0x5   :  { %17 = vsyncpa [#allocation9], 0  ;;  %s988_s27 = smul.u32 12288, %s1320_s2  ;;  %s1216_s28 = smov [#allocation7]  }
   0x6   :  { %s24_s29 = sshll.u32 %s1216_s28, 4  ;;  %s1140_s10 = scalar_lea.hbm %s1322_s4, 384  ;;  %s25_s29 = int_to_ptr.vmem [resolvable:$true] %s24_s29 }
   0x7   :  { %s1270_s8 = scalar_lea.hbm %s1323_s5, %s988_s27  ;;  %p1141_p0 = scmp.ne.s32.totalorder %s1322_s4, %s1140_s10 }
   0x8   :  { %p1144_p1 = scmp.lt.u32.totalorder %s1140_s10, %s1322_s4 }
   0xa   :  { %p1146_p2 = pnand %p1144_p1, %p1141_p0 }
   0xc   :  { %1149 = shalt.err (!%p1146_p2)
}
   0xd   :  { %s1150_s2 = scalar_lea.vmem %s25_s29, 384  ;;  %p1155_p4 = scmp.lt.s32.totalorder %s25_s29, %s25_s29 }
   0xe   :  { %p1151_p3 = scmp.ne.s32.totalorder %s25_s29, %s1150_s2  ;;  %p1156_p5 = scmp.lt.s32.totalorder %s1150_s2, %s1150_s2 }
  0x10   :  { %p1157_p6 = por %p1156_p5, %p1155_p4 }
  0x12   :  { %p1158_p7 = pnand %p1157_p6, %p1151_p3 }
  0x14   :  { %1161 = shalt.err (!%p1158_p7)
}
  0x15   :  { %27 = dma.hbm_to_vmem [thread:$0]  %s1322_s4, 384, %s25_s29, [#allocation8]  }
  0x16   :  { %s1217_s16 = smov [#allocation10]   ;;  %s1162_s18 = scalar_lea.hbm %s1270_s8, 12288 }
  0x17   :  { %s38_s17 = sshll.u32 %s1217_s16, 4  ;;  %p1163_p8 = scmp.ne.s32.totalorder %s1270_s8, %s1162_s18  ;;  %s39_s17 = int_to_ptr.vmem [resolvable:$true] %s38_s17 }
  0x18   :  { %s1164_s21 = scalar_lea.hbm %s1323_s5, 12288  ;;  %p1165_p9 = scmp.lt.u32.totalorder %s1270_s8, %s1323_s5 }
  0x19   :  { %p1166_p10 = scmp.lt.u32.totalorder %s1164_s21, %s1162_s18  ;;  %p1168_p12 = scmp.lt.u32.totalorder %s1162_s18, %s1270_s8 }
  0x1b   :  { %p1167_p11 = por %p1166_p10, %p1165_p9 }
  0x1d   :  { %p1169_p13 = por %p1168_p12, %p1167_p11 }
  0x1f   :  { %p1170_p0 = pnand %p1169_p13, %p1163_p8 }
  0x21   :  { %1173 = shalt.err (!%p1170_p0)
}
  0x22   :  { %s1174_s4 = scalar_lea.vmem %s39_s17, 12288  ;;  %p1179_p2 = scmp.lt.s32.totalorder %s39_s17, %s39_s17 }
  0x23   :  { %p1175_p1 = scmp.ne.s32.totalorder %s39_s17, %s1174_s4  ;;  %p1180_p3 = scmp.lt.s32.totalorder %s1174_s4, %s1174_s4 }
  0x25   :  { %p1181_p4 = por %p1180_p3, %p1179_p2 }
  0x27   :  { %p1182_p5 = pnand %p1181_p4, %p1175_p1 }
  0x29   :  { %1185 = shalt.err (!%p1182_p5)
}
  0x2a   :  { %s1218_s24 = smov 256   ;;  %s1219_s25 = smov 16  }
  0x2b   :  { %44 = dma.hbm_to_vmem [thread:$0]  %s1270_s8, 12288, %s39_s17, [#allocation11], %s1218_s24, %s1218_s24, %s1219_s25  }
  0x2c   :  { %1210 = dma.done.wait [#allocation8], 384  }
  0x2d   :  { %1211 = vsyncadd [#allocation8], 4294966912 }
  0x2e   :  { %1212 = dma.done.wait [#allocation11], 12288  }
  0x2f   :  { %1213 = vsyncadd [#allocation11], 4294955008  ;;  %p689_p6 = scmp.ne.s32.totalorder %s1318_s0, 1 }
  0x30   :  { %v1220_v0 = vmov (!%p689_p6), 0.0  }
  0x31   :  { %61 = sbr.rel (%p689_p6) target bundleno = 56 (0x38), region = 21  ;;  %62 = vst [vmem:[#allocation12] sm:$0xff] (!%p689_p6), %v1220_v0  ;;  %63 = vst [vmem:[#allocation12 + $0x8] sm:$0xff] (!%p689_p6), %v1220_v0 }
  0x32   :  { %64 = vst [vmem:[#allocation12 + $0x10] sm:$0xff] (!%p689_p6), %v1220_v0  ;;  %65 = vst [vmem:[#allocation12 + $0x18] sm:$0xff] (!%p689_p6), %v1220_v0 }
  0x38 PF:  { %p690_p7 = scmp.ge.s32.totalorder %s1318_s0, 2 }
  0x39   :  { %v996_v1 = vld [vmem:[#allocation10 + $0x4] ss:$16 sps:$4 sm:$0xff] (!%p690_p7)   ;;  %v998_v2 = vld [vmem:[#allocation10 + $0xc] ss:$16 sps:$4 sm:$0xff] (!%p690_p7)   ;;  %v1000_v3 = vld [vmem:[#allocation10] ss:$16 sps:$4 sm:$0xff] (!%p690_p7)  }
  0x3a   :  { %69 = sbr.rel (%p690_p7) target bundleno = 370 (0x172), region = 25  ;;  %697 = vmatprep.subr.bf16.mxu0 (!%p690_p7), %v996_v1  ;;  %v1001_v4 = vld [vmem:[#allocation10 + $0x8] ss:$16 sps:$4 sm:$0xff] (!%p690_p7)   ;;  %793 = vmatprep.subr.bf16.mxu1 (!%p690_p7), %v998_v2  ;;  %v1002_v5 = vld [vmem:[#allocation10 + $0x24] ss:$16 sps:$4 sm:$0xff] (!%p690_p7)   ;;  %s1301_s0 = sld [smem:[#allocation6]] (!%p690_p7) }
  0x3b   :  { %699 = vmatpush1.bf16.msra.mxu0 (!%p690_p7), %v1000_v3  ;;  %795 = vmatpush1.bf16.msra.mxu1 (!%p690_p7), %v1001_v4  ;;  %v1004_v6 = vld [vmem:[#allocation10 + $0x2c] ss:$16 sps:$4 sm:$0xff] (!%p690_p7)   ;;  %v1006_v7 = vld [vmem:[#allocation10 + $0x20] ss:$16 sps:$4 sm:$0xff] (!%p690_p7)   ;;  %v1007_v8 = vld [vmem:[#allocation10 + $0x28] ss:$16 sps:$4 sm:$0xff] (!%p690_p7)  }
  0x3c   :  { %701 = vmatprep.subr.bf16.mxu0 (!%p690_p7), %v1002_v5  ;;  %797 = vmatprep.subr.bf16.mxu1 (!%p690_p7), %v1004_v6  ;;  %v1008_v9 = vld [vmem:[#allocation10 + $0x44] ss:$16 sps:$4 sm:$0xff] (!%p690_p7)   ;;  %v1010_v10 = vld [vmem:[#allocation10 + $0x4c] ss:$16 sps:$4 sm:$0xff] (!%p690_p7)   ;;  %v1012_v11 = vld [vmem:[#allocation10 + $0x40] ss:$16 sps:$4 sm:$0xff] (!%p690_p7)  }
  0x3d   :  { %v1013_v12 = vld [vmem:[#allocation10 + $0x48] ss:$16 sps:$4 sm:$0xff] (!%p690_p7)   ;;  %v1014_v13 = vld [vmem:[#allocation10 + $0x64] ss:$16 sps:$4 sm:$0xff] (!%p690_p7)   ;;  %v1016_v14 = vld [vmem:[#allocation10 + $0x6c] ss:$16 sps:$4 sm:$0xff] (!%p690_p7)  }
  0x3e   :  { %v1018_v15 = vld [vmem:[#allocation10 + $0x60] ss:$16 sps:$4 sm:$0xff] (!%p690_p7)   ;;  %v1019_v16 = vld [vmem:[#allocation10 + $0x68] ss:$16 sps:$4 sm:$0xff] (!%p690_p7)   ;;  %v1020_v17 = vld [vmem:[#allocation10 + $0x84] ss:$16 sps:$4 sm:$0xff] (!%p690_p7)  }
  0x3f   :  { %703 = vmatpush1.bf16.msra.mxu0 (!%p690_p7), %v1006_v7  ;;  %799 = vmatpush1.bf16.msra.mxu1 (!%p690_p7), %v1007_v8  ;;  %v1022_v18 = vld [vmem:[#allocation10 + $0x8c] ss:$16 sps:$4 sm:$0xff] (!%p690_p7)   ;;  %v1024_v19 = vld [vmem:[#allocation10 + $0x80] ss:$16 sps:$4 sm:$0xff] (!%p690_p7)   ;;  %v1025_v20 = vld [vmem:[#allocation10 + $0x88] ss:$16 sps:$4 sm:$0xff] (!%p690_p7)  }
  0x40   :  { %705 = vmatprep.subr.bf16.mxu0 (!%p690_p7), %v1008_v9  ;;  %801 = vmatprep.subr.bf16.mxu1 (!%p690_p7), %v1010_v10  ;;  %v1026_v21 = vld [vmem:[#allocation10 + $0xa4] ss:$16 sps:$4 sm:$0xff] (!%p690_p7)   ;;  %v1028_v22 = vld [vmem:[#allocation10 + $0xac] ss:$16 sps:$4 sm:$0xff] (!%p690_p7)   ;;  %v1030_v23 = vld [vmem:[#allocation10 + $0xa0] ss:$16 sps:$4 sm:$0xff] (!%p690_p7)  }
  0x41   :  { %v1031_v24 = vld [vmem:[#allocation10 + $0xa8] ss:$16 sps:$4 sm:$0xff]   ;;  %v1032_v25 = vld [vmem:[#allocation10 + $0xc4] ss:$16 sps:$4 sm:$0xff]   ;;  %v1034_v26 = vld [vmem:[#allocation10 + $0xcc] ss:$16 sps:$4 sm:$0xff]  }
  0x42   :  { %v1036_v27 = vld [vmem:[#allocation10 + $0xc0] ss:$16 sps:$4 sm:$0xff]   ;;  %v1037_v28 = vld [vmem:[#allocation10 + $0xc8] ss:$16 sps:$4 sm:$0xff]   ;;  %v1038_v29 = vld [vmem:[#allocation10 + $0xe4] ss:$16 sps:$4 sm:$0xff]  }
  0x43   :  { %707 = vmatpush1.bf16.msra.mxu0 %v1012_v11  ;;  %803 = vmatpush1.bf16.msra.mxu1 %v1013_v12  ;;  %v1040_v30 = vld [vmem:[#allocation10 + $0xec] ss:$16 sps:$4 sm:$0xff]   ;;  %v1042_v31 = vld [vmem:[#allocation10 + $0xe0] ss:$16 sps:$4 sm:$0xff]   ;;  %v1043_v32 = vld [vmem:[#allocation10 + $0xe8] ss:$16 sps:$4 sm:$0xff]  }
  0x44   :  { %709 = vmatprep.subr.bf16.mxu0 %v1014_v13  ;;  %805 = vmatprep.subr.bf16.mxu1 %v1016_v14  ;;  %v1044_v33 = vld [vmem:[#allocation10 + $0x104] ss:$16 sps:$4 sm:$0xff]   ;;  %v1046_v34 = vld [vmem:[#allocation10 + $0x10c] ss:$16 sps:$4 sm:$0xff]   ;;  %v1048_v35 = vld [vmem:[#allocation10 + $0x100] ss:$16 sps:$4 sm:$0xff]  }
  0x45   :  { %v1049_v36 = vld [vmem:[#allocation10 + $0x108] ss:$16 sps:$4 sm:$0xff]   ;;  %v1050_v37 = vld [vmem:[#allocation10 + $0x124] ss:$16 sps:$4 sm:$0xff]   ;;  %v1052_v38 = vld [vmem:[#allocation10 + $0x12c] ss:$16 sps:$4 sm:$0xff]  }
  0x46   :  { %v1054_v39 = vld [vmem:[#allocation10 + $0x120] ss:$16 sps:$4 sm:$0xff]   ;;  %s694_s29 = smul.u32 24, %s1301_s0  ;;  %v1055_v40 = vld [vmem:[#allocation10 + $0x128] ss:$16 sps:$4 sm:$0xff]   ;;  %v1221_v13 = vmov 0.0  }
  0x47   :  { %711 = vmatpush1.bf16.msra.mxu0 %v1018_v15  ;;  %807 = vmatpush1.bf16.msra.mxu1 %v1019_v16  ;;  %v1056_v41 = vld [vmem:[#allocation10 + $0x144] ss:$16 sps:$4 sm:$0xff]   ;;  %v1058_v42 = vld [vmem:[#allocation10 + $0x14c] ss:$16 sps:$4 sm:$0xff]   ;;  %v1060_v43 = vld [vmem:[#allocation10 + $0x140] ss:$16 sps:$4 sm:$0xff]  }
  0x48   :  { %713 = vmatprep.subr.bf16.mxu0 %v1020_v17  ;;  %809 = vmatprep.subr.bf16.mxu1 %v1022_v18  ;;  %v1061_v44 = vld [vmem:[#allocation10 + $0x148] ss:$16 sps:$4 sm:$0xff]   ;;  %v1062_v45 = vld [vmem:[#allocation10 + $0x164] ss:$16 sps:$4 sm:$0xff]   ;;  %v1064_v46 = vld [vmem:[#allocation10 + $0x16c] ss:$16 sps:$4 sm:$0xff]  }
  0x49   :  { %s1304_s30 = scalar_lea.vmem [#allocation7], %s694_s29  ;;  %v1066_v48 = vld [vmem:[#allocation10 + $0x160] ss:$16 sps:$4 sm:$0xff]   ;;  %v1067_v49 = vld [vmem:[#allocation10 + $0x168] ss:$16 sps:$4 sm:$0xff]  }
  0x4a   :  { %v75_v47 = vld [vmem:[%s1304_s30 + $0x8] sm:$0xff]  ;;  %v1070_v51 = vld [vmem:[#allocation10 + $0x18c] ss:$16 sps:$4 sm:$0xff]   ;;  %v1073_v53 = vld [vmem:[#allocation10 + $0x188] ss:$16 sps:$4 sm:$0xff]  }
  0x4b   :  { %715 = vmatpush1.bf16.msra.mxu0 %v1024_v19  ;;  %811 = vmatpush1.bf16.msra.mxu1 %v1025_v20  ;;  %v1068_v50 = vld [vmem:[#allocation10 + $0x184] ss:$16 sps:$4 sm:$0xff]   ;;  %v1072_v52 = vld [vmem:[#allocation10 + $0x180] ss:$16 sps:$4 sm:$0xff]   ;;  %v1076_v55 = vld [vmem:[#allocation10 + $0x1ac] ss:$16 sps:$4 sm:$0xff]  }
  0x4c   :  { %717 = vmatprep.subr.bf16.mxu0 %v1026_v21  ;;  %813 = vmatprep.subr.bf16.mxu1 %v1028_v22  ;;  %v1074_v54 = vld [vmem:[#allocation10 + $0x1a4] ss:$16 sps:$4 sm:$0xff]   ;;  %v1078_v56 = vld [vmem:[#allocation10 + $0x1a0] ss:$16 sps:$4 sm:$0xff]   ;;  %v1079_v57 = vld [vmem:[#allocation10 + $0x1a8] ss:$16 sps:$4 sm:$0xff]  }
  0x4d   :  { %433 = vmatprep.mubr.f32.mxu0 %v75_v47  ;;  %575 = vmatprep.mubr.f32.mxu1 %v75_v47  ;;  %v1080_v58 = vld [vmem:[#allocation10 + $0x1c4] ss:$16 sps:$4 sm:$0xff]   ;;  %v1082_v59 = vld [vmem:[#allocation10 + $0x1cc] ss:$16 sps:$4 sm:$0xff]   ;;  %v1084_v60 = vld [vmem:[#allocation10 + $0x1c0] ss:$16 sps:$4 sm:$0xff]  }
  0x4e   :  { %v1085_v61 = vld [vmem:[#allocation10 + $0x1c8] ss:$16 sps:$4 sm:$0xff]   ;;  %v1086_v62 = vld [vmem:[#allocation10 + $0x1e4] ss:$16 sps:$4 sm:$0xff]   ;;  %v1088_v63 = vld [vmem:[#allocation10 + $0x1ec] ss:$16 sps:$4 sm:$0xff]  }
  0x4f   :  { %719 = vmatpush1.bf16.msra.mxu0 %v1030_v23  ;;  %815 = vmatpush1.bf16.msra.mxu1 %v1031_v24  ;;  %v1090_v0 = vld [vmem:[#allocation10 + $0x1e0] ss:$16 sps:$4 sm:$0xff]   ;;  %v1091_v1 = vld [vmem:[#allocation10 + $0x1e8] ss:$16 sps:$4 sm:$0xff]   ;;  %v1092_v2 = vld [vmem:[#allocation10 + $0x204] ss:$16 sps:$4 sm:$0xff]  }
  0x50   :  { %721 = vmatprep.subr.bf16.mxu0 %v1032_v25  ;;  %817 = vmatprep.subr.bf16.mxu1 %v1034_v26  ;;  %v1095_v3 = vld [vmem:[#allocation10 + $0x20c] ss:$16 sps:$4 sm:$0xff]   ;;  %v1094_v4 = vld [vmem:[#allocation10 + $0x200] ss:$16 sps:$4 sm:$0xff]   ;;  %v1097_v5 = vld [vmem:[#allocation10 + $0x208] ss:$16 sps:$4 sm:$0xff]  }
  0x51   :  { %v74_v6 = vld [vmem:[%s1304_s30] sm:$0xff]  ;;  %v1098_v7 = vld [vmem:[#allocation10 + $0x224] ss:$16 sps:$4 sm:$0xff]   ;;  %v1100_v9 = vld [vmem:[#allocation10 + $0x220] ss:$16 sps:$4 sm:$0xff]  }
  0x52   :  { %v1101_v8 = vld [vmem:[#allocation10 + $0x22c] ss:$16 sps:$4 sm:$0xff]   ;;  %v1103_v10 = vld [vmem:[#allocation10 + $0x228] ss:$16 sps:$4 sm:$0xff]   ;;  %v1104_v11 = vld [vmem:[#allocation10 + $0x244] ss:$16 sps:$4 sm:$0xff]  }
  0x53   :  { %723 = vmatpush1.bf16.msra.mxu0 %v1036_v27  ;;  %819 = vmatpush1.bf16.msra.mxu1 %v1037_v28  ;;  %v1107_v12 = vld [vmem:[#allocation10 + $0x24c] ss:$16 sps:$4 sm:$0xff]   ;;  %v1106_v14 = vld [vmem:[#allocation10 + $0x240] ss:$16 sps:$4 sm:$0xff]   ;;  %v1109_v15 = vld [vmem:[#allocation10 + $0x248] ss:$16 sps:$4 sm:$0xff]  }
  0x54   :  { %725 = vmatprep.subr.bf16.mxu0 %v1038_v29  ;;  %821 = vmatprep.subr.bf16.mxu1 %v1040_v30  ;;  %v1110_v16 = vld [vmem:[#allocation10 + $0x264] ss:$16 sps:$4 sm:$0xff]   ;;  %v1113_v17 = vld [vmem:[#allocation10 + $0x26c] ss:$16 sps:$4 sm:$0xff]   ;;  %v1112_v18 = vld [vmem:[#allocation10 + $0x260] ss:$16 sps:$4 sm:$0xff]  }
  0x55   :  { %v1115_v19 = vld [vmem:[#allocation10 + $0x268] ss:$16 sps:$4 sm:$0xff]   ;;  %v1116_v20 = vld [vmem:[#allocation10 + $0x284] ss:$16 sps:$4 sm:$0xff]   ;;  %v1119_v21 = vld [vmem:[#allocation10 + $0x28c] ss:$16 sps:$4 sm:$0xff]  }
  0x56   :  { %v1118_v22 = vld [vmem:[#allocation10 + $0x280] ss:$16 sps:$4 sm:$0xff]   ;;  %v1121_v23 = vld [vmem:[#allocation10 + $0x288] ss:$16 sps:$4 sm:$0xff]   ;;  %v1122_v24 = vld [vmem:[#allocation10 + $0x2a4] ss:$16 sps:$4 sm:$0xff]  }
  0x57   :  { %727 = vmatpush1.bf16.msra.mxu0 %v1042_v31  ;;  %823 = vmatpush1.bf16.msra.mxu1 %v1043_v32  ;;  %v1125_v25 = vld [vmem:[#allocation10 + $0x2ac] ss:$16 sps:$4 sm:$0xff]   ;;  %v1124_v26 = vld [vmem:[#allocation10 + $0x2a0] ss:$16 sps:$4 sm:$0xff]   ;;  %v1127_v27 = vld [vmem:[#allocation10 + $0x2a8] ss:$16 sps:$4 sm:$0xff]  }
  0x58   :  { %729 = vmatprep.subr.bf16.mxu0 %v1044_v33  ;;  %825 = vmatprep.subr.bf16.mxu1 %v1046_v34  ;;  %v1128_v28 = vld [vmem:[#allocation10 + $0x2c4] ss:$16 sps:$4 sm:$0xff]   ;;  %v1131_v29 = vld [vmem:[#allocation10 + $0x2cc] ss:$16 sps:$4 sm:$0xff]   ;;  %v1130_v30 = vld [vmem:[#allocation10 + $0x2c0] ss:$16 sps:$4 sm:$0xff]  }
  0x59   :  { %v1133_v31 = vld [vmem:[#allocation10 + $0x2c8] ss:$16 sps:$4 sm:$0xff]   ;;  %v1134_v32 = vld [vmem:[#allocation10 + $0x2e4] ss:$16 sps:$4 sm:$0xff]   ;;  %v1137_v33 = vld [vmem:[#allocation10 + $0x2ec] ss:$16 sps:$4 sm:$0xff]  }
  0x5a   :  { %v1136_v34 = vld [vmem:[#allocation10 + $0x2e0] ss:$16 sps:$4 sm:$0xff]  }
  0x5b   :  { %731 = vmatpush1.bf16.msra.mxu0 %v1048_v35  ;;  %827 = vmatpush1.bf16.msra.mxu1 %v1049_v36  ;;  %v1139_v35 = vld [vmem:[#allocation10 + $0x2e8] ss:$16 sps:$4 sm:$0xff]  }
  0x5c   :  { %733 = vmatprep.subr.bf16.mxu0 %v1050_v37  ;;  %829 = vmatprep.subr.bf16.mxu1 %v1052_v38  ;;  %v76_v36 = vld [vmem:[%s1304_s30 + $0x10] sm:$0xff]  ;;  %v365_v37 = vld [vmem:[#allocation12] sm:$0xff]  ;;  %v367_v38 = vld [vmem:[#allocation12 + $0x10] sm:$0xff] }
  0x5f   :  { %735 = vmatpush1.bf16.msra.mxu0 %v1054_v39  ;;  %831 = vmatpush1.bf16.msra.mxu1 %v1055_v40  ;;  %v366_v39 = vld [vmem:[#allocation12 + $0x8] sm:$0xff]  ;;  %v368_v40 = vld [vmem:[#allocation12 + $0x18] sm:$0xff] }
  0x60   :  { %737 = vmatprep.subr.bf16.mxu0 %v1056_v41  ;;  %833 = vmatprep.subr.bf16.mxu1 %v1058_v42 }
  0x63   :  { %739 = vmatpush1.bf16.msra.mxu0 %v1060_v43  ;;  %835 = vmatpush1.bf16.msra.mxu1 %v1061_v44 }
  0x64   :  { %741 = vmatprep.subr.bf16.mxu0 %v1062_v45  ;;  %837 = vmatprep.subr.bf16.mxu1 %v1064_v46 }
  0x67   :  { %743 = vmatpush1.bf16.msra.mxu0 %v1066_v48  ;;  %839 = vmatpush1.bf16.msra.mxu1 %v1067_v49 }
  0x68   :  { %745 = vmatprep.subr.bf16.mxu0 %v1068_v50  ;;  %841 = vmatprep.subr.bf16.mxu1 %v1070_v51 }
  0x6b   :  { %747 = vmatpush1.bf16.msra.mxu0 %v1072_v52  ;;  %843 = vmatpush1.bf16.msra.mxu1 %v1073_v53 }
  0x6c   :  { %749 = vmatprep.subr.bf16.mxu0 %v1074_v54  ;;  %845 = vmatprep.subr.bf16.mxu1 %v1076_v55 }
  0x6f   :  { %751 = vmatpush1.bf16.msra.mxu0 %v1078_v56  ;;  %847 = vmatpush1.bf16.msra.mxu1 %v1079_v57 }
  0x70   :  { %753 = vmatprep.subr.bf16.mxu0 %v1080_v58  ;;  %849 = vmatprep.subr.bf16.mxu1 %v1082_v59 }
  0x73   :  { %755 = vmatpush1.bf16.msra.mxu0 %v1084_v60  ;;  %851 = vmatpush1.bf16.msra.mxu1 %v1085_v61 }
  0x74   :  { %757 = vmatprep.subr.bf16.mxu0 %v1086_v62  ;;  %853 = vmatprep.subr.bf16.mxu1 %v1088_v63 }
  0x77   :  { %759 = vmatpush1.bf16.msra.mxu0 %v1090_v0  ;;  %855 = vmatpush1.bf16.msra.mxu1 %v1091_v1 }
  0x78   :  { %761 = vmatprep.subr.bf16.mxu0 %v1092_v2  ;;  %857 = vmatprep.subr.bf16.mxu1 %v1095_v3 }
  0x7a   :  { %434 = vmatmul.mubr.f32.vlgmr.msra.gmra.mrb[0].mxu0 %v74_v6  ;;  %576 = vmatmul.mubr.f32.vlgmr.msra.gmra.mrb[0].mxu1 %v74_v6 }
  0x7b   :  { %763 = vmatpush1.bf16.msra.mxu0 %v1094_v4  ;;  %859 = vmatpush1.bf16.msra.mxu1 %v1097_v5 }
  0x7c   :  { %765 = vmatprep.subr.bf16.mxu0 %v1098_v7  ;;  %861 = vmatprep.subr.bf16.mxu1 %v1101_v8 }
  0x7d   :  { %504 = vmatprep.mubr.f32.mxu0 %v1221_v13  ;;  %646 = vmatprep.mubr.f32.mxu1 %v1221_v13 }
  0x7f   :  { %767 = vmatpush1.bf16.msra.mxu0 %v1100_v9  ;;  %863 = vmatpush1.bf16.msra.mxu1 %v1103_v10 }
  0x80   :  { %769 = vmatprep.subr.bf16.mxu0 %v1104_v11  ;;  %865 = vmatprep.subr.bf16.mxu1 %v1107_v12 }
  0x83   :  { %771 = vmatpush1.bf16.msra.mxu0 %v1106_v14  ;;  %867 = vmatpush1.bf16.msra.mxu1 %v1109_v15 }
  0x84   :  { %773 = vmatprep.subr.bf16.mxu0 %v1110_v16  ;;  %869 = vmatprep.subr.bf16.mxu1 %v1113_v17 }
  0x87   :  { %775 = vmatpush1.bf16.msra.mxu0 %v1112_v18  ;;  %871 = vmatpush1.bf16.msra.mxu1 %v1115_v19 }
  0x88   :  { %777 = vmatprep.subr.bf16.mxu0 %v1116_v20  ;;  %873 = vmatprep.subr.bf16.mxu1 %v1119_v21 }
  0x8b   :  { %779 = vmatpush1.bf16.msra.mxu0 %v1118_v22  ;;  %875 = vmatpush1.bf16.msra.mxu1 %v1121_v23 }
  0x8c   :  { %781 = vmatprep.subr.bf16.mxu0 %v1122_v24  ;;  %877 = vmatprep.subr.bf16.mxu1 %v1125_v25 }
  0x8f   :  { %783 = vmatpush1.bf16.msra.mxu0 %v1124_v26  ;;  %879 = vmatpush1.bf16.msra.mxu1 %v1127_v27 }
  0x90   :  { %785 = vmatprep.subr.bf16.mxu0 %v1128_v28  ;;  %881 = vmatprep.subr.bf16.mxu1 %v1131_v29 }
  0x93   :  { %787 = vmatpush1.bf16.msra.mxu0 %v1130_v30  ;;  %883 = vmatpush1.bf16.msra.mxu1 %v1133_v31 }
  0x94   :  { %789 = vmatprep.subr.bf16.mxu0 %v1134_v32  ;;  %885 = vmatprep.subr.bf16.mxu1 %v1137_v33 }
  0x97   :  { %791 = vmatpush1.bf16.msra.mxu0 %v1136_v34  ;;  %887 = vmatpush1.bf16.msra.mxu1 %v1139_v35 }
  0x9a   :  { %505 = vmatmul.mubr.f32.vlgmr.msra.gmra.mrb[0].mxu0 %v76_v36  ;;  %647 = vmatmul.mubr.f32.vlgmr.msra.gmra.mrb[0].mxu1 %v76_v36 }
 0x16d   :  { %v506_v41 = vpop.f32.mrb[0].mxu0  ;;  %v648_v42 = vpop.f32.mrb[0].mxu1 }
 0x16e   :  { %v653_v43 = vadd.f32 %v506_v41, %v365_v37  ;;  %v655_v44 = vadd.f32 %v648_v42, %v367_v38  ;;  %v508_v45 = vpop.f32.mrb[1].mxu0  ;;  %v650_v46 = vpop.f32.mrb[1].mxu1 }
 0x16f   :  { %v654_v47 = vadd.f32 %v508_v45, %v366_v39  ;;  %v656_v48 = vadd.f32 %v650_v46, %v368_v40 }
 0x170   :  { %657 = vst [vmem:[#allocation12] sm:$0xff] %v653_v43  ;;  %659 = vst [vmem:[#allocation12 + $0x10] sm:$0xff] %v655_v44 }
 0x171   :  { %658 = vst [vmem:[#allocation12 + $0x8] sm:$0xff] %v654_v47  ;;  %660 = vst [vmem:[#allocation12 + $0x18] sm:$0xff] %v656_v48 }
 0x172 PF:  { %s664_s7 = sld [smem:[#allocation4]]  ;;  %s1222_s8 = smov [#allocation12]  }
 0x173   :  { %s672_s1 = sshll.u32 %s1222_s8, 4  ;;  %s673_s1 = int_to_ptr.vmem [resolvable:$true] %s672_s1 }
 0x174   :  { %s1186_s12 = scalar_lea.vmem %s673_s1, 512  ;;  %p1191_p9 = scmp.lt.s32.totalorder %s673_s1, %s673_s1 }
 0x175   :  { %p1187_p8 = scmp.ne.s32.totalorder %s673_s1, %s1186_s12  ;;  %p1192_p10 = scmp.lt.s32.totalorder %s1186_s12, %s1186_s12 }
 0x177   :  { %p1193_p11 = por %p1192_p10, %p1191_p9 }
 0x178   :  { %s695_s9 = sshll.u32 %s664_s7, 9 }
 0x179   :  { %s670_s11 = scalar_lea.hbm %s1324_s6, %s695_s9  ;;  %p1194_p12 = pnand %p1193_p11, %p1187_p8 }
 0x17b   :  { %1197 = shalt.err (!%p1194_p12)
}
 0x17c   :  { %s1198_s13 = scalar_lea.hbm %s670_s11, 512  ;;  %s1200_s15 = scalar_lea.hbm %s1324_s6, 512 }
 0x17d   :  { %p1199_p13 = scmp.ne.s32.totalorder %s670_s11, %s1198_s13  ;;  %p1201_p0 = scmp.lt.u32.totalorder %s670_s11, %s1324_s6 }
 0x17e   :  { %p1202_p1 = scmp.lt.u32.totalorder %s1200_s15, %s1198_s13  ;;  %p1204_p3 = scmp.lt.u32.totalorder %s1198_s13, %s670_s11 }
 0x180   :  { %p1203_p2 = por %p1202_p1, %p1201_p0 }
 0x182   :  { %p1205_p4 = por %p1204_p3, %p1203_p2 }
 0x184   :  { %p1206_p5 = pnand %p1205_p4, %p1199_p13 }
 0x186   :  { %1209 = shalt.err (!%p1206_p5)
}
 0x187   :  { %675 = dma.vmem_to_hbm [thread:$0]  %s673_s1, 512, %s670_s11, [#allocation9]  }
 0x188   :  { %1214 = dma.done.wait [#allocation9], 512  }
 0x189   :  { %1215 = vsyncadd [#allocation9], 4294966784 }
 0x18a   :  { %679 = vsyncpa [#allocation8], 1 }
 0x18b   :  { %680 = vsyncpa [#allocation11], 1 }
 0x18c   :  { %681 = vsyncpa [#allocation9], 1 }

</bundles_post_ra>
